<compile_context>
chip_gen: v7x
topology: tpu7x:2x2x1
jax: 0.10.0
libtpu: 0.0.40
codegen_flags: <defaults>
</compile_context>

<pallas_src>
import functools

import jax
import jax.numpy as jnp
from jax.experimental import pallas as pl
from jax.experimental.pallas import tpu as pltpu


def _round_up(x, m):
    return (x + m - 1) // m * m


def _cdiv(a, b):
    return (a + b - 1) // b


def _vmem_capacity_bytes():
    """Physical VMEM of the attached TPU (fallback: v7x's 64 MiB)."""
    try:
        info = pltpu.get_tpu_info()
        cap = getattr(info, "vmem_capacity_bytes", None)
        if cap:
            return int(cap)
    except Exception:
        pass
    return 64 * 1024 * 1024


# ---------------------------------------------------------------------------
# Kernels
# ---------------------------------------------------------------------------
def _conv_bn_relu_kernel(x_ref, w_ref, b_ref, o_ref, *, relu6):
    """Single contraction block: one MXU dot + fused BN-bias/ReLU epilogue.

    x_ref : (1, th, Wout_p, Kc)      im2col rows for this (batch, row-tile)
    w_ref : (Kc, Cout_p)             BN-scale-folded weights (bf16)
    b_ref : (1, Cout_p)              folded BN bias (f32)
    o_ref : (1, th, Wout_p, Cout_p)  lane-dense output tile
    """
    _, th, wout_p, kc = x_ref.shape
    patch = x_ref[0].reshape(th * wout_p, kc)      # free: wout_p % sublane == 0
    y = jnp.dot(patch, w_ref[...], preferred_element_type=jnp.float32)
    y = y + b_ref[...]
    y = jnp.maximum(y, 0.0)
    if relu6:
        y = jnp.minimum(y, 6.0)
    o_ref[0] = y.reshape(th, wout_p, -1).astype(o_ref.dtype)


def _conv_bn_relu_kernel_ksplit(x_ref, w_ref, b_ref, o_ref, acc_ref, *, relu6):
    """Contraction split across grid axis 2; f32 VMEM accumulator."""
    kk = pl.program_id(2)
    _, th, wout_p, kc = x_ref.shape
    patch = x_ref[0].reshape(th * wout_p, kc)
    contrib = jnp.dot(patch, w_ref[...], preferred_element_type=jnp.float32)

    @pl.when(kk == 0)
    def _():
        acc_ref[...] = contrib

    @pl.when(kk > 0)
    def _():
        acc_ref[...] += contrib

    @pl.when(kk == pl.num_programs(2) - 1)
    def _():
        y = acc_ref[...] + b_ref[...]
        y = jnp.maximum(y, 0.0)
        if relu6:
            y = jnp.minimum(y, 6.0)
        o_ref[0] = y.reshape(th, wout_p, -1).astype(o_ref.dtype)


# ---------------------------------------------------------------------------
# Wrapper
# ---------------------------------------------------------------------------
def conv_bn_relu(x_nchw, weight_oihw, gamma, beta, running_mean, running_var,
                 *, stride=1, padding=0, dilation=1, groups=1, relu6=False,
                 eps=1e-5, compute_dtype=jnp.bfloat16):
    """Forward pass of _ConvBNReLU (groups=1), eval-mode BatchNorm."""
    assert groups == 1, "TODO(synk): grouped/depthwise conv not implemented"
    n, cin, h, w = x_nchw.shape
    cout, cin_w, kh_, kw_ = weight_oihw.shape
    assert cin_w == cin and kh_ == kw_, "groups=1, square kernels only"
    k = kh_

    h_out = (h + 2 * padding - dilation * (k - 1) - 1) // stride + 1
    w_out = (w + 2 * padding - dilation * (k - 1) - 1) // stride + 1
    out_itemsize = jnp.dtype(x_nchw.dtype).itemsize

    # ---- aligned compute geometry ----------------------------------------
    cout_p = _round_up(cout, 128)                     # lane-dense outputs
    sub_tile = max(8, 32 // jnp.dtype(compute_dtype).itemsize)   # 16 for bf16
    w_out_p = _round_up(w_out, sub_tile)              # free (th,W,C)<->(th*W,C)
    kkcin = k * k * cin
    kk_tot = _round_up(kkcin, 128)                    # lane-dense contraction

    # ---- per-chip VMEM budget ---------------------------------------------
    vmem_cap = _vmem_capacity_bytes()
    vmem_limit = min(int(vmem_cap * 0.75), 96 * 1024 * 1024)
    budget = min(int(vmem_cap * 0.45), 56 * 1024 * 1024)

    # Split the contraction across a grid axis only if one weight block would
    # hog VMEM (rare: very large Cin).
    tk, nk = kk_tot, 1
    max_w_block = budget // 6
    if tk * cout_p * 2 > max_w_block:
        tk = max(128, (max_w_block // (cout_p * 2)) // 128 * 128)
        nk = _cdiv(kk_tot, tk)
        kk_tot = nk * tk

    def _footprint(th):
        x_blk = th * w_out_p * tk * 2                  # bf16 input block
        w_blk = tk * cout_p * 2
        o_blk = th * w_out_p * cout_p * out_itemsize
        acc = th * w_out_p * cout_p * 4 if nk > 1 else 0
        return 2 * (x_blk + w_blk + o_blk + cout_p * 4) + acc   # 2x = dbl-buf

    # ---- output-row tile: biggest that fits the budget / MXU M-dim cap ----
    n_rt = 1
    while True:
        th = _round_up(_cdiv(h_out, n_rt), 8)
        if th <= 8:
            break
        if _footprint(th) <= budget and th * w_out_p <= 4096:
            break
        n_rt += 1
    if n * n_rt < 2 and h_out > 8:        # keep both TensorCores busy (v7x)
        n_rt = 2
        th = _round_up(_cdiv(h_out, n_rt), 8)
    h_out_pp = n_rt * th

    # ---- host-side prep: NHWC + zero pad + im2col + BN fold ----------------
    x = jnp.transpose(x_nchw, (0, 2, 3, 1)).astype(compute_dtype)   # NHWC
    h_need = (h_out_pp - 1) * stride + dilation * (k - 1) + 1
    w_need = (w_out_p - 1) * stride + dilation * (k - 1) + 1
    pad_bottom = max(0, h_need - h - padding)
    pad_right = max(0, w_need - w - padding)
    xp = jnp.pad(x, ((0, 0), (padding, pad_bottom),
                     (padding, pad_right), (0, 0)))

    cols = []
    for kh in range(k):
        for kw in range(k):
            h0 = kh * dilation
            w0 = kw * dilation
            cols.append(jax.lax.slice(
                xp, (0, h0, w0, 0),
                (n, h0 + (h_out_pp - 1) * stride + 1,
                 w0 + (w_out_p - 1) * stride + 1, cin),
                (1, stride, stride, 1)))
    x_col = jnp.concatenate(cols, axis=-1)      # (n, Hout_pp, Wout_p, K*K*Cin)
    x_col = jnp.pad(x_col, ((0, 0), (0, 0), (0, 0), (0, kk_tot - kkcin)))

    scale = gamma.astype(jnp.float32) / jnp.sqrt(
        running_var.astype(jnp.float32) + eps)
    bias = beta.astype(jnp.float32) - running_mean.astype(jnp.float32) * scale
    w_kkio = jnp.transpose(weight_oihw, (2, 3, 1, 0)).astype(jnp.float32) * scale
    w2d = w_kkio.reshape(kkcin, cout)
    w2d = jnp.pad(w2d, ((0, kk_tot - kkcin), (0, cout_p - cout)))
    w2d = w2d.astype(compute_dtype)
    bias_p = jnp.pad(bias, (0, cout_p - cout)).reshape(1, cout_p)

    # ---- pallas_call --------------------------------------------------------
    flops = 2 * n * h_out * w_out * k * k * cin * cout
    bytes_accessed = int(n * h_out_pp * w_out_p * kk_tot * 2
                         + kk_tot * cout_p * 2
                         + n * h_out_pp * w_out_p * cout_p * out_itemsize)

    if nk == 1:
        grid = (n, n_rt)
        in_specs = [
            pl.BlockSpec((1, th, w_out_p, kk_tot), lambda b, r: (b, r, 0, 0)),
            pl.BlockSpec((kk_tot, cout_p), lambda b, r: (0, 0)),
            pl.BlockSpec((1, cout_p), lambda b, r: (0, 0)),
        ]
        out_spec = pl.BlockSpec((1, th, w_out_p, cout_p),
                                lambda b, r: (b, r, 0, 0))
        scratch = []
        kernel = functools.partial(_conv_bn_relu_kernel, relu6=relu6)
        semantics = ("parallel", "parallel")
    else:
        grid = (n, n_rt, nk)
        in_specs = [
            pl.BlockSpec((1, th, w_out_p, tk), lambda b, r, kk: (b, r, 0, kk)),
            pl.BlockSpec((tk, cout_p), lambda b, r, kk: (kk, 0)),
            pl.BlockSpec((1, cout_p), lambda b, r, kk: (0, 0)),
        ]
        out_spec = pl.BlockSpec((1, th, w_out_p, cout_p),
                                lambda b, r, kk: (b, r, 0, 0))
        scratch = [pltpu.VMEM((th * w_out_p, cout_p), jnp.float32)]
        kernel = functools.partial(_conv_bn_relu_kernel_ksplit, relu6=relu6)
        semantics = ("parallel", "parallel", "arbitrary")

    out = pl.pallas_call(
        kernel,
        out_shape=jax.ShapeDtypeStruct((n, h_out_pp, w_out_p, cout_p),
                                       x_nchw.dtype),
        grid=grid,
        in_specs=in_specs,
        out_specs=out_spec,
        scratch_shapes=scratch,
        compiler_params=pltpu.CompilerParams(
            dimension_semantics=semantics,
            vmem_limit_bytes=vmem_limit),
        cost_estimate=pl.CostEstimate(flops=flops, transcendentals=0,
                                      bytes_accessed=bytes_accessed),
    )(x_col, w2d, bias_p)

    out = out[:, :h_out, :w_out, :cout]
    return jnp.transpose(out, (0, 3, 1, 2))      # NHWC -> NCHW (PyTorch conv.)


# ---------------------------------------------------------------------------
# Reference + test
# ---------------------------------------------------------------------------
def _reference(x, weight, gamma, beta, mean, var, *, stride, padding, dilation,
               relu6, eps=1e-5, compute_dtype=jnp.float32):
    """Pure-JAX reference mirroring the kernel's numerics when compute_dtype=bf16."""
    scale = gamma / jnp.sqrt(var + eps)
    w_folded = weight * scale[:, None, None, None]
    y = jax.lax.conv_general_dilated(
        x.astype(compute_dtype), w_folded.astype(compute_dtype),
        window_strides=(stride, stride),
        padding=[(padding, padding), (padding, padding)],
        rhs_dilation=(dilation, dilation),
        dimension_numbers=("NCHW", "OIHW", "NCHW"),
        preferred_element_type=jnp.float32)
    y = y + (beta - mean * scale).reshape(1, -1, 1, 1)
    y = jnp.maximum(y, 0.0)
    if relu6:
        y = jnp.minimum(y, 6.0)
    return y.astype(x.dtype)


if __name__ == "__main__":
    # _ConvBNReLU(in_channels=4, out_channels=8, kernel_size=3, stride=1, padding=1)
    N, CIN, H, W = 2, 4, 16, 16
    COUT, K = 8, 3
    STRIDE, PADDING, DILATION, RELU6 = 1, 1, 1, False

    key = jax.random.PRNGKey(0)
    k_x, k_w, k_g, k_b, k_m, k_v = jax.random.split(key, 6)

    x = jax.random.normal(k_x, (N, CIN, H, W), dtype=jnp.float32)
    weight = jax.random.normal(k_w, (COUT, CIN, K, K), dtype=jnp.float32) * 0.1
    gamma = 1.0 + 0.1 * jax.random.normal(k_g, (COUT,), dtype=jnp.float32)
    beta = 0.1 * jax.random.normal(k_b, (COUT,), dtype=jnp.float32)
    running_mean = 0.1 * jax.random.normal(k_m, (COUT,), dtype=jnp.float32)
    running_var = jnp.abs(jax.random.normal(k_v, (COUT,), dtype=jnp.float32)) + 0.5

    fwd = jax.jit(functools.partial(
        conv_bn_relu, stride=STRIDE, padding=PADDING, dilation=DILATION,
        relu6=RELU6))
    out = jax.block_until_ready(
        fwd(x, weight, gamma, beta, running_mean, running_var))
    assert out.shape == (N, COUT, H, W), out.shape

    # Tight check vs. a reference with identical bf16-operand / f32-accum numerics.
    ref_bf16 = _reference(x, weight, gamma, beta, running_mean, running_var,
                          stride=STRIDE, padding=PADDING, dilation=DILATION,
                          relu6=RELU6, compute_dtype=jnp.bfloat16)
    assert jnp.allclose(out, ref_bf16, atol=2e-3, rtol=2e-3), \
        float(jnp.max(jnp.abs(out - ref_bf16)))

    # Loose sanity check vs. the full-f32 reference (bf16 operand tolerance).
    ref_f32 = _reference(x, weight, gamma, beta, running_mean, running_var,
                         stride=STRIDE, padding=PADDING, dilation=DILATION,
                         relu6=RELU6, compute_dtype=jnp.float32)
    assert jnp.allclose(out, ref_f32, atol=1e-1, rtol=1e-1), \
        float(jnp.max(jnp.abs(out - ref_f32)))

    print("KERNEL_OK")
</pallas_src>

<mosaic_0001>
module attributes {stable_mosaic.version = 11 : i64} {
  func.func @_conv_bn_relu_kernel(%arg0: i32, %arg1: i32, %arg2: memref<1x16x16x128xbf16, #tpu.memory_space<vmem>>, %arg3: memref<128x128xbf16, #tpu.memory_space<vmem>>, %arg4: memref<1x128xf32, #tpu.memory_space<vmem>>, %arg5: memref<1x16x16x128xf32, #tpu.memory_space<vmem>>) attributes {dimension_semantics = [#tpu.dimension_semantics<parallel>, #tpu.dimension_semantics<parallel>], iteration_bounds = array<i64: 2, 1>, scalar_prefetch = 0 : i64, scratch_operands = 0 : i64, tpu.core_type = #tpu.core_type<tc>, window_params = [{transform_indices = @transform_0, window_bounds = array<i64: 1, 16, 16, 128>}, {pipeline_mode = #tpu.pipeline_mode<synchronous>, transform_indices = @transform_1, window_bounds = array<i64: 128, 128>}, {pipeline_mode = #tpu.pipeline_mode<synchronous>, transform_indices = @transform_2, window_bounds = array<i64: 1, 128>}, {transform_indices = @transform_3, window_bounds = array<i64: 1, 16, 16, 128>}]} {
    %c0 = arith.constant 0 : index
    %c0_0 = arith.constant 0 : index
    %c0_1 = arith.constant 0 : index
    %c0_2 = arith.constant 0 : index
    %0 = vector.load %arg2[%c0, %c0_0, %c0_1, %c0_2] : memref<1x16x16x128xbf16, #tpu.memory_space<vmem>>, vector<1x16x16x128xbf16>
    %1 = vector.shape_cast %0 : vector<1x16x16x128xbf16> to vector<16x16x128xbf16>
    %2 = vector.shape_cast %1 : vector<16x16x128xbf16> to vector<256x128xbf16>
    %c0_3 = arith.constant 0 : index
    %c0_4 = arith.constant 0 : index
    %3 = vector.load %arg3[%c0_3, %c0_4] : memref<128x128xbf16, #tpu.memory_space<vmem>>, vector<128x128xbf16>
    %cst = arith.constant dense<0.000000e+00> : vector<256x128xf32>
    %4 = tpu.matmul %2, %3, %cst {dimension_numbers = #tpu.dot_dimension_numbers<[1], [0], [0], [1], [0, 0, 1, 1], [], []>} : vector<256x128xbf16>, vector<128x128xbf16>, vector<256x128xf32> -> vector<256x128xf32>
    %c0_5 = arith.constant 0 : index
    %c0_6 = arith.constant 0 : index
    %5 = vector.load %arg4[%c0_5, %c0_6] : memref<1x128xf32, #tpu.memory_space<vmem>>, vector<1x128xf32>
    %6 = vector.broadcast %5 : vector<1x128xf32> to vector<256x128xf32>
    %7 = arith.addf %4, %6 : vector<256x128xf32>
    %cst_7 = arith.constant 0.000000e+00 : f32
    %8 = vector.broadcast %cst_7 : f32 to vector<256x128xf32>
    %9 = arith.maximumf %7, %8 : vector<256x128xf32>
    %10 = vector.shape_cast %9 : vector<256x128xf32> to vector<16x16x128xf32>
    %c0_8 = arith.constant 0 : index
    %c0_9 = arith.constant 0 : index
    %c0_10 = arith.constant 0 : index
    %c0_11 = arith.constant 0 : index
    %11 = vector.load %arg5[%c0_8, %c0_9, %c0_10, %c0_11] : memref<1x16x16x128xf32, #tpu.memory_space<vmem>>, vector<1x16x16x128xf32>
    %12 = vector.shape_cast %11 : vector<1x16x16x128xf32> to vector<16x16x128xf32>
    %13 = vector.shape_cast %10 : vector<16x16x128xf32> to vector<1x16x16x128xf32>
    tpu.vector_store %arg5[%c0_8, %c0_9, %c0_10, %c0_11], %13 {strides = array<i32>} : memref<1x16x16x128xf32, #tpu.memory_space<vmem>>, vector<1x16x16x128xf32>,
    return
  }
  func.func @transform_0(%arg0: i32, %arg1: i32) -> (i32, i32, i32, i32) {
    %c0_i32 = arith.constant 0 : i32
    %c0_i32_0 = arith.constant 0 : i32
    %c0_i32_1 = arith.constant 0 : i32
    return %arg0, %arg1, %c0_i32, %c0_i32_0 : i32, i32, i32, i32
  }
  func.func @transform_1(%arg0: i32, %arg1: i32) -> (i32, i32) {
    %c0_i32 = arith.constant 0 : i32
    %c0_i32_0 = arith.constant 0 : i32
    %c0_i32_1 = arith.constant 0 : i32
    return %c0_i32, %c0_i32_0 : i32, i32
  }
  func.func @transform_2(%arg0: i32, %arg1: i32) -> (i32, i32) {
    %c0_i32 = arith.constant 0 : i32
    %c0_i32_0 = arith.constant 0 : i32
    %c0_i32_1 = arith.constant 0 : i32
    return %c0_i32, %c0_i32_0 : i32, i32
  }
  func.func @transform_3(%arg0: i32, %arg1: i32) -> (i32, i32, i32, i32) {
    %c0_i32 = arith.constant 0 : i32
    %c0_i32_0 = arith.constant 0 : i32
    %c0_i32_1 = arith.constant 0 : i32
    return %arg0, %arg1, %c0_i32, %c0_i32_0 : i32, i32, i32, i32
  }
}

</mosaic_0001>

<bundles_post_ra>
// kernel: conv_bn_relu.1
= control target key start
LH: loop header
LB: loop body
LE: loop exit
PB: predicated region body
PF: predicated region fallthrough
CT: control target
= control target key end

     0   :  { %s954_s12 = smov 0   ;;  %s956_s13 = smov 0   ;;  %s1104_s0 = inlined_call_operand.vmem [shape: bf16[2,16,16,128], index: 0, kind: input, shape index: {}]   ;;  %s1105_s1 = inlined_call_operand.vmem [shape: bf16[128,128], index: 1, kind: input, shape index: {}]   ;;  %s1106_s2 = inlined_call_operand.vmem [shape: f32[1,128], index: 2, kind: input, shape index: {}]   ;;  %s1107_s3 = inlined_call_operand.vmem [shape: f32[2,16,16,128], index: 3, kind: output, shape index: {}]  }
   0x1   :  { %s958_s14 = smov 0  }
   0x2 LB: > { %s25_s15 = sadd.s32 1, %s928_s13  ;;  %p740_p0 = scmp.ge.s32.totalorder %s932_s14, 1  ;;  %s932_s14 = sphi %s958_s14, %s13_s14   ;;  %s928_s13 = sphi %s956_s13, %s1109_s13   ;;  %s924_s12 = sphi %s954_s12, %s1108_s12  }
   0x3   : > { %p27_p1 = scmp.ge.s32.totalorder %s25_s15, 2  ;;  %p159_p2 = scmp.lt.s32.totalorder %s932_s14, 3 }
   0x5   : > { %s1111_s15 = smov (%p27_p1, %s25_s15), 0  ;;  %p160_p3 = pnand %p740_p0, %p159_p2 }
   0x6   : > { %v886_v0 = vld [vmem:[%s1105_s1] sm:$0xff] (!%p160_p3)   ;;  %p194_p4 = scmp.lt.s32.totalorder (!%p160_p3), %s924_s12, 1  ;;  %v887_v1 = vld [vmem:[%s1105_s1 + $0x8] sm:$0xff] (!%p160_p3)   ;;  %v888_v2 = vld [vmem:[%s1105_s1 + $0x10] sm:$0xff] (!%p160_p3)  }
   0x7   : > { %163 = sbr.rel (%p160_p3) target bundleno = 283 (0x11b), region = 32  ;;  %798 = vmatprep.subr.bf16.mxu0 (!%p160_p3), %v886_v0  ;;  %846 = vmatprep.subr.bf16.mxu1 (!%p160_p3), %v886_v0  ;;  %v889_v3 = vld [vmem:[%s1105_s1 + $0x18] sm:$0xff] (!%p160_p3)   ;;  %v890_v6 = vld [vmem:[%s1105_s1 + $0x20] sm:$0xff] (!%p160_p3)   ;;  %v891_v7 = vld [vmem:[%s1105_s1 + $0x28] sm:$0xff] (!%p160_p3)  }
   0x8   : > { %799 = vmatpush3.bf16.msra.mxu0 (!%p160_p3), %v886_v0  ;;  %854 = vmatpush3.bf16.msra.mxu1 (!%p160_p3), %v886_v0  ;;  %v892_v8 = vld [vmem:[%s1105_s1 + $0x30] sm:$0xff] (!%p160_p3)   ;;  %v893_v9 = vld [vmem:[%s1105_s1 + $0x38] sm:$0xff] (!%p160_p3)   ;;  %v1023_v24 = vld [vmem:[%s1106_s2] ss:$0 sm:$0xff] (!%p160_p3) }
   0x9   : > { %800 = vmatprep.subr.bf16.mxu0 (!%p160_p3), %v887_v1  ;;  %847 = vmatprep.subr.bf16.mxu1 (!%p160_p3), %v887_v1 }
   0xc   : > { %801 = vmatpush3.bf16.msra.mxu0 (!%p160_p3), %v887_v1  ;;  %855 = vmatpush3.bf16.msra.mxu1 (!%p160_p3), %v887_v1 }
   0xd   : > { %802 = vmatprep.subr.bf16.mxu0 (!%p160_p3), %v888_v2  ;;  %848 = vmatprep.subr.bf16.mxu1 (!%p160_p3), %v888_v2 }
   0xe   : > { %s1113_s12 = smov (!%p194_p4, %s924_s12), 1 }
   0xf   : > { %s772_s22 = sshll.u32 %s1113_s12, 7  ;;  %s773_s11 = sshll.u32 %s1113_s12, 8 }
  0x10   : > { %s987_s25 = scalar_lea.vmem %s1104_s0, %s772_s22  ;;  %803 = vmatpush3.bf16.msra.mxu0 %v888_v2  ;;  %856 = vmatpush3.bf16.msra.mxu1 %v888_v2  ;;  %s1031_s18 = scalar_lea.vmem %s1107_s3, %s773_s11 }
  0x11   : > { %v894_v4 = vld [vmem:[%s987_s25] sm:$0xff]   ;;  %804 = vmatprep.subr.bf16.mxu0 %v889_v3  ;;  %849 = vmatprep.subr.bf16.mxu1 %v889_v3  ;;  %v896_v10 = vld [vmem:[%s987_s25 + $0x8] sm:$0xff]   ;;  %v898_v12 = vld [vmem:[%s987_s25 + $0x10] sm:$0xff]  }
  0x12   : > { %v895_v5 = vld [vmem:[%s987_s25 + $0x40] sm:$0xff]   ;;  %814 = vmatprep.mubr.bf16.mxu0 %v894_v4  ;;  %v897_v11 = vld [vmem:[%s987_s25 + $0x48] sm:$0xff]   ;;  %v899_v13 = vld [vmem:[%s987_s25 + $0x50] sm:$0xff]  }
  0x13   : > { %830 = vmatprep.mubr.bf16.mxu1 %v895_v5  ;;  %v900_v14 = vld [vmem:[%s987_s25 + $0x18] sm:$0xff]   ;;  %v902_v16 = vld [vmem:[%s987_s25 + $0x20] sm:$0xff]   ;;  %v904_v18 = vld [vmem:[%s987_s25 + $0x28] sm:$0xff]  }
  0x14   : > { %805 = vmatpush3.bf16.msra.mxu0 %v889_v3  ;;  %857 = vmatpush3.bf16.msra.mxu1 %v889_v3  ;;  %v901_v15 = vld [vmem:[%s987_s25 + $0x58] sm:$0xff]   ;;  %v903_v17 = vld [vmem:[%s987_s25 + $0x60] sm:$0xff]   ;;  %v905_v19 = vld [vmem:[%s987_s25 + $0x68] sm:$0xff]  }
  0x15   : > { %806 = vmatprep.subr.bf16.mxu0 %v890_v6  ;;  %850 = vmatprep.subr.bf16.mxu1 %v890_v6  ;;  %v906_v20 = vld [vmem:[%s987_s25 + $0x30] sm:$0xff]   ;;  %v908_v22 = vld [vmem:[%s987_s25 + $0x38] sm:$0xff]  }
  0x16   : > { %v907_v21 = vld [vmem:[%s987_s25 + $0x70] sm:$0xff]   ;;  %v909_v23 = vld [vmem:[%s987_s25 + $0x78] sm:$0xff]  }
  0x18   : > { %807 = vmatpush3.bf16.msra.mxu0 %v890_v6  ;;  %858 = vmatpush3.bf16.msra.mxu1 %v890_v6 }
  0x19   : > { %808 = vmatprep.subr.bf16.mxu0 %v891_v7  ;;  %851 = vmatprep.subr.bf16.mxu1 %v891_v7 }
  0x1c   : > { %809 = vmatpush3.bf16.msra.mxu0 %v891_v7  ;;  %859 = vmatpush3.bf16.msra.mxu1 %v891_v7 }
  0x1d   : > { %810 = vmatprep.subr.bf16.mxu0 %v892_v8  ;;  %852 = vmatprep.subr.bf16.mxu1 %v892_v8 }
  0x20   : > { %811 = vmatpush3.bf16.msra.mxu0 %v892_v8  ;;  %860 = vmatpush3.bf16.msra.mxu1 %v892_v8 }
  0x21   : > { %812 = vmatprep.subr.bf16.mxu0 %v893_v9  ;;  %853 = vmatprep.subr.bf16.mxu1 %v893_v9 }
  0x24   : > { %813 = vmatpush3.bf16.msra.mxu0 %v893_v9  ;;  %861 = vmatpush3.bf16.msra.mxu1 %v893_v9 }
  0x27   : > { %815 = vmatmul.mubr.bf16.vlgmr.msra.gmra.mrb[0].mxu0 %v896_v10  ;;  %831 = vmatmul.mubr.bf16.vlgmr.msra.gmra.mrb[0].mxu1 %v897_v11 }
  0x28   : > { %818 = vmatprep.mubr.bf16.mxu0 %v898_v12  ;;  %834 = vmatprep.mubr.bf16.mxu1 %v899_v13 }
  0x2f   : > { %819 = vmatmul.mubr.bf16.gmra.mrb[4].mxu0 %v900_v14  ;;  %835 = vmatmul.mubr.bf16.gmra.mrb[4].mxu1 %v901_v15 }
  0x30   : > { %822 = vmatprep.mubr.bf16.mxu0 %v902_v16  ;;  %838 = vmatprep.mubr.bf16.mxu1 %v903_v17 }
  0x37   : > { %823 = vmatmul.mubr.bf16.gmra.mrb[8].mxu0 %v904_v18  ;;  %839 = vmatmul.mubr.bf16.gmra.mrb[8].mxu1 %v905_v19 }
  0x38   : > { %826 = vmatprep.mubr.bf16.mxu0 %v906_v20  ;;  %842 = vmatprep.mubr.bf16.mxu1 %v907_v21 }
  0x3f   : > { %827 = vmatmul.mubr.bf16.gmra.mrb[12].mxu0 %v908_v22  ;;  %843 = vmatmul.mubr.bf16.gmra.mrb[12].mxu1 %v909_v23 }
  0xfa   : > { %v816_v25 = vpop.f32.mrb[0].mxu0  ;;  %v832_v26 = vpop.f32.mrb[0].mxu1 }
  0xfb   : > { %v458_v27 = vadd.f32 %v816_v25, %v1023_v24  ;;  %v522_v28 = vadd.f32 %v832_v26, %v1023_v24  ;;  %v449_v29 = vpop.f32.mrb[1].mxu0  ;;  %v513_v30 = vpop.f32.mrb[1].mxu1 }
  0xfc   : > { %v450_v31 = vadd.f32 %v1023_v24, %v449_v29  ;;  %v514_v32 = vadd.f32 %v1023_v24, %v513_v30  ;;  %v817_v33 = vpop.f32.mrb[2].mxu0  ;;  %v833_v34 = vpop.f32.mrb[2].mxu1 }
  0xfd   : > { %v578_v35 = vmax.f32 %v458_v27, 0.0  ;;  %v594_v36 = vmax.f32 %v522_v28, 0.0  ;;  %v461_v37 = vadd.f32 %v817_v33, %v1023_v24  ;;  %v525_v38 = vadd.f32 %v833_v34, %v1023_v24  ;;  %v452_v39 = vpop.f32.mrb[3].mxu0  ;;  %v516_v40 = vpop.f32.mrb[3].mxu1 }
  0xfe   : > { %v576_v41 = vmax.f32 %v450_v31, 0.0  ;;  %v592_v42 = vmax.f32 %v514_v32, 0.0  ;;  %v453_v43 = vadd.f32 %v1023_v24, %v452_v39  ;;  %v517_v44 = vadd.f32 %v1023_v24, %v516_v40 }
  0xff   : > { %610 = vst [vmem:[%s1031_s18 + $0x10] sm:$0xff] %v578_v35  ;;  %626 = vst [vmem:[%s1031_s18 + $0x90] sm:$0xff] %v594_v36  ;;  %v579_v45 = vmax.f32 %v461_v37, 0.0  ;;  %v595_v46 = vmax.f32 %v525_v38, 0.0 }
 0x100   : > { %608 = vst [vmem:[%s1031_s18] sm:$0xff] %v576_v41  ;;  %624 = vst [vmem:[%s1031_s18 + $0x80] sm:$0xff] %v592_v42  ;;  %v577_v47 = vmax.f32 %v453_v43, 0.0  ;;  %v593_v48 = vmax.f32 %v517_v44, 0.0 }
 0x101   : > { %611 = vst [vmem:[%s1031_s18 + $0x18] sm:$0xff] %v579_v45  ;;  %627 = vst [vmem:[%s1031_s18 + $0x98] sm:$0xff] %v595_v46 }
 0x102   : > { %609 = vst [vmem:[%s1031_s18 + $0x8] sm:$0xff] %v577_v47  ;;  %625 = vst [vmem:[%s1031_s18 + $0x88] sm:$0xff] %v593_v48  ;;  %v820_v49 = vpop.f32.mrb[4].mxu0  ;;  %v836_v50 = vpop.f32.mrb[4].mxu1 }
 0x103   : > { %v474_v51 = vadd.f32 %v820_v49, %v1023_v24  ;;  %v538_v52 = vadd.f32 %v836_v50, %v1023_v24  ;;  %v465_v53 = vpop.f32.mrb[5].mxu0  ;;  %v529_v54 = vpop.f32.mrb[5].mxu1 }
 0x104   : > { %v466_v55 = vadd.f32 %v1023_v24, %v465_v53  ;;  %v530_v56 = vadd.f32 %v1023_v24, %v529_v54  ;;  %v821_v57 = vpop.f32.mrb[6].mxu0  ;;  %v837_v58 = vpop.f32.mrb[6].mxu1 }
 0x105   : > { %v582_v59 = vmax.f32 %v474_v51, 0.0  ;;  %v598_v60 = vmax.f32 %v538_v52, 0.0  ;;  %v477_v61 = vadd.f32 %v821_v57, %v1023_v24  ;;  %v541_v62 = vadd.f32 %v837_v58, %v1023_v24  ;;  %v468_v63 = vpop.f32.mrb[7].mxu0  ;;  %v532_v0 = vpop.f32.mrb[7].mxu1 }
 0x106   : > { %v580_v1 = vmax.f32 %v466_v55, 0.0  ;;  %v596_v2 = vmax.f32 %v530_v56, 0.0  ;;  %v469_v3 = vadd.f32 %v1023_v24, %v468_v63  ;;  %v533_v4 = vadd.f32 %v1023_v24, %v532_v0 }
 0x107   : > { %614 = vst [vmem:[%s1031_s18 + $0x30] sm:$0xff] %v582_v59  ;;  %630 = vst [vmem:[%s1031_s18 + $0xb0] sm:$0xff] %v598_v60  ;;  %v583_v5 = vmax.f32 %v477_v61, 0.0  ;;  %v599_v6 = vmax.f32 %v541_v62, 0.0 }
 0x108   : > { %612 = vst [vmem:[%s1031_s18 + $0x20] sm:$0xff] %v580_v1  ;;  %628 = vst [vmem:[%s1031_s18 + $0xa0] sm:$0xff] %v596_v2  ;;  %v581_v7 = vmax.f32 %v469_v3, 0.0  ;;  %v597_v8 = vmax.f32 %v533_v4, 0.0 }
 0x109   : > { %615 = vst [vmem:[%s1031_s18 + $0x38] sm:$0xff] %v583_v5  ;;  %631 = vst [vmem:[%s1031_s18 + $0xb8] sm:$0xff] %v599_v6 }
 0x10a   : > { %613 = vst [vmem:[%s1031_s18 + $0x28] sm:$0xff] %v581_v7  ;;  %629 = vst [vmem:[%s1031_s18 + $0xa8] sm:$0xff] %v597_v8  ;;  %v824_v9 = vpop.f32.mrb[8].mxu0  ;;  %v840_v10 = vpop.f32.mrb[8].mxu1 }
 0x10b   : > { %v490_v11 = vadd.f32 %v824_v9, %v1023_v24  ;;  %v554_v12 = vadd.f32 %v840_v10, %v1023_v24  ;;  %v481_v13 = vpop.f32.mrb[9].mxu0  ;;  %v545_v14 = vpop.f32.mrb[9].mxu1 }
 0x10c   : > { %v482_v15 = vadd.f32 %v1023_v24, %v481_v13  ;;  %v546_v16 = vadd.f32 %v1023_v24, %v545_v14  ;;  %v825_v17 = vpop.f32.mrb[10].mxu0  ;;  %v841_v18 = vpop.f32.mrb[10].mxu1 }
 0x10d   : > { %v586_v19 = vmax.f32 %v490_v11, 0.0  ;;  %v602_v20 = vmax.f32 %v554_v12, 0.0  ;;  %v493_v21 = vadd.f32 %v825_v17, %v1023_v24  ;;  %v557_v22 = vadd.f32 %v841_v18, %v1023_v24  ;;  %v484_v23 = vpop.f32.mrb[11].mxu0  ;;  %v548_v25 = vpop.f32.mrb[11].mxu1 }
 0x10e   : > { %v584_v26 = vmax.f32 %v482_v15, 0.0  ;;  %v600_v27 = vmax.f32 %v546_v16, 0.0  ;;  %v485_v28 = vadd.f32 %v1023_v24, %v484_v23  ;;  %v549_v29 = vadd.f32 %v1023_v24, %v548_v25 }
 0x10f   : > { %618 = vst [vmem:[%s1031_s18 + $0x50] sm:$0xff] %v586_v19  ;;  %634 = vst [vmem:[%s1031_s18 + $0xd0] sm:$0xff] %v602_v20  ;;  %v587_v30 = vmax.f32 %v493_v21, 0.0  ;;  %v603_v31 = vmax.f32 %v557_v22, 0.0 }
 0x110   : > { %616 = vst [vmem:[%s1031_s18 + $0x40] sm:$0xff] %v584_v26  ;;  %632 = vst [vmem:[%s1031_s18 + $0xc0] sm:$0xff] %v600_v27  ;;  %v585_v32 = vmax.f32 %v485_v28, 0.0  ;;  %v601_v33 = vmax.f32 %v549_v29, 0.0 }
 0x111   : > { %619 = vst [vmem:[%s1031_s18 + $0x58] sm:$0xff] %v587_v30  ;;  %635 = vst [vmem:[%s1031_s18 + $0xd8] sm:$0xff] %v603_v31 }
 0x112   : > { %617 = vst [vmem:[%s1031_s18 + $0x48] sm:$0xff] %v585_v32  ;;  %633 = vst [vmem:[%s1031_s18 + $0xc8] sm:$0xff] %v601_v33  ;;  %v828_v34 = vpop.f32.mrb[12].mxu0  ;;  %v844_v35 = vpop.f32.mrb[12].mxu1 }
 0x113   : > { %v506_v36 = vadd.f32 %v828_v34, %v1023_v24  ;;  %v570_v37 = vadd.f32 %v844_v35, %v1023_v24  ;;  %v497_v38 = vpop.f32.mrb[13].mxu0  ;;  %v561_v39 = vpop.f32.mrb[13].mxu1 }
 0x114   : > { %v498_v40 = vadd.f32 %v1023_v24, %v497_v38  ;;  %v562_v41 = vadd.f32 %v1023_v24, %v561_v39  ;;  %v829_v42 = vpop.f32.mrb[14].mxu0  ;;  %v845_v43 = vpop.f32.mrb[14].mxu1 }
 0x115   : > { %v590_v44 = vmax.f32 %v506_v36, 0.0  ;;  %v606_v45 = vmax.f32 %v570_v37, 0.0  ;;  %v509_v46 = vadd.f32 %v829_v42, %v1023_v24  ;;  %v573_v47 = vadd.f32 %v845_v43, %v1023_v24  ;;  %v500_v48 = vpop.f32.mrb[15].mxu0  ;;  %v564_v49 = vpop.f32.mrb[15].mxu1 }
 0x116   : > { %v588_v50 = vmax.f32 %v498_v40, 0.0  ;;  %v604_v51 = vmax.f32 %v562_v41, 0.0  ;;  %v501_v52 = vadd.f32 %v1023_v24, %v500_v48  ;;  %v565_v53 = vadd.f32 %v1023_v24, %v564_v49 }
 0x117   : > { %622 = vst [vmem:[%s1031_s18 + $0x70] sm:$0xff] %v590_v44  ;;  %638 = vst [vmem:[%s1031_s18 + $0xf0] sm:$0xff] %v606_v45  ;;  %v591_v54 = vmax.f32 %v509_v46, 0.0  ;;  %v607_v55 = vmax.f32 %v573_v47, 0.0 }
 0x118   : > { %620 = vst [vmem:[%s1031_s18 + $0x60] sm:$0xff] %v588_v50  ;;  %636 = vst [vmem:[%s1031_s18 + $0xe0] sm:$0xff] %v604_v51  ;;  %v589_v56 = vmax.f32 %v501_v52, 0.0  ;;  %v605_v57 = vmax.f32 %v565_v53, 0.0 }
 0x119   : > { %623 = vst [vmem:[%s1031_s18 + $0x78] sm:$0xff] %v591_v54  ;;  %639 = vst [vmem:[%s1031_s18 + $0xf8] sm:$0xff] %v607_v55 }
 0x11a   : > { %621 = vst [vmem:[%s1031_s18 + $0x68] sm:$0xff] %v589_v56  ;;  %637 = vst [vmem:[%s1031_s18 + $0xe8] sm:$0xff] %v605_v57 }
 0x11b PF: > { %s13_s14 = sadd.s32 1, %s932_s14   ;;  %s1108_s12 = smov %s928_s13 }
 0x11c   : > { %p10_p5 = scmp.ge.s32.totalorder %s13_s14, 4   ;;  %s1109_s13 = smov %s1111_s15 }
 0x11e   :  { %12 = sbr.rel (!%p10_p5) target bundleno = 2 (0x2), region = 62 }

</bundles_post_ra>
